<compile_context>
chip_gen: v7x
topology: tpu7x:2x2x1
jax: 0.10.0
libtpu: 0.0.40
codegen_flags: <defaults>
</compile_context>

<pallas_src>
import jax
import jax.numpy as jnp
from jax import lax
from jax.experimental import pallas as pl
from jax.experimental.pallas import tpu as pltpu


def _round_up(n, m):
    return ((n + m - 1) // m) * m


def planar_flow_kernel(x_ref, w_ref, uhatT_ref, c_ref, b_ref,
                       xo_ref, ld_ref, t_ref):
    """One batch tile of the planar-flow chain (batch on lanes).

    x_ref:     (D, TB)  VMEM  input tile (batch -> lanes)
    w_ref:     (L, D)   VMEM  stacked w params
    uhatT_ref: (D, L)   VMEM  stacked u_hat params, transposed
    c_ref:     (L, L)   SMEM  coupling matrix C[l, j] = w_l . u_hat_j
    b_ref:     (L,)     SMEM  biases
    xo_ref:    (D, TB)  VMEM  output tile
    ld_ref:    (1, TB)  VMEM  lane-dense log-det row
    t_ref:     (L, TB)  VMEM  scratch: tanh activations per flow step
    """
    L = w_ref.shape[0]
    TB = x_ref.shape[1]

    # All per-step cross-feature dot products collapse into one MXU matmul
    # against the ORIGINAL input x0; the serial correction only needs the
    # scalar coupling coefficients C[l, j] (j < l).
    acts0 = jnp.dot(w_ref[...].astype(jnp.float32),
                    x_ref[...].astype(jnp.float32),
                    preferred_element_type=jnp.float32,
                    precision=lax.Precision.HIGHEST)          # (L, TB)

    ld = jnp.zeros((1, TB), jnp.float32)

    # Chain length is small and static -> unrolled; per step this is a handful
    # of lane-dense (1, TB) VPU/EUP ops with scalar (SMEM) coefficients.
    # TODO(synk): for long chains (L >> 8) switch to a lax.fori_loop recurrence
    #             over the VMEM-resident T to bound vreg live ranges.
    for l in range(L):
        a = acts0[l:l + 1, :] + b_ref[l]                      # (1, TB)
        for j in range(l):
            a = a + c_ref[l, j] * t_ref[pl.ds(j, 1), :]       # scalar * row
        t = jnp.tanh(a)                                       # EUP, full lanes
        t_ref[pl.ds(l, 1), :] = t
        uw = c_ref[l, l]                                      # u_hat_l . w_l
        ld = ld + jnp.log(jnp.abs(1.0 + (1.0 - t * t) * uw))

    # x_out = x0 + U_hat^T @ T : second MXU matmul replaces L rank-1 VPU updates.
    xo = x_ref[...].astype(jnp.float32) + jnp.dot(
        uhatT_ref[...].astype(jnp.float32), t_ref[...],
        preferred_element_type=jnp.float32,
        precision=lax.Precision.HIGHEST)                      # (D, TB)

    xo_ref[...] = xo.astype(xo_ref.dtype)
    ld_ref[...] = ld.astype(ld_ref.dtype)


def flow_forward(x, W, U, B, *, block_b=None):
    """Planar-flow chain. x: (Bsz, D); W, U: (L, D); B: (L,).

    Returns (x_out (Bsz, D), log_det (Bsz, 1)) matching the PyTorch module.
    """
    Bsz, D = x.shape
    L = W.shape[0]

    # ---- parameter-only reparameterization (pure-JAX glue) -------------------
    W = W.astype(jnp.float32)
    U = U.astype(jnp.float32)
    inner = jnp.sum(W * U, axis=1, keepdims=True)                   # (L, 1)
    m_inner = jax.nn.softplus(inner) - 1.0
    w_sqnorm = jnp.sum(W * W, axis=1, keepdims=True)                # (L, 1)
    U_hat = U + (m_inner - inner) * W / w_sqnorm                    # (L, D)
    # Coupling matrix: C[l, j] = w_l . u_hat_j.  Strict lower triangle feeds the
    # serial recurrence; the diagonal is the log-det term u_hat_l . w_l.
    C = jnp.dot(W, U_hat.T, precision=lax.Precision.HIGHEST)        # (L, L)
    b = B.reshape(L).astype(jnp.float32)                            # (L,)

    # ---- batch tiling: batch maps to lanes, block_b multiple of 128 ----------
    if block_b is None:
        block_b = min(1024, _round_up(Bsz, 128))
    block_b = max(128, _round_up(block_b, 128))
    Bp = _round_up(Bsz, block_b)          # pad: no tail rows silently dropped
    nb = Bp // block_b

    xT = jnp.pad(x.astype(jnp.float32), ((0, Bp - Bsz), (0, 0))).T  # (D, Bp)

    xoT, ldT = pl.pallas_call(
        planar_flow_kernel,
        out_shape=(
            jax.ShapeDtypeStruct((D, Bp), jnp.float32),
            jax.ShapeDtypeStruct((1, Bp), jnp.float32),
        ),
        grid_spec=pltpu.PrefetchScalarGridSpec(
            num_scalar_prefetch=0,
            grid=(nb,),
            in_specs=[
                pl.BlockSpec((D, block_b), lambda i: (0, i)),        # x tile
                pl.BlockSpec((L, D), lambda i: (0, 0)),              # W (full)
                pl.BlockSpec((D, L), lambda i: (0, 0)),              # U_hat^T
                pl.BlockSpec(memory_space=pltpu.MemorySpace.SMEM),   # C (L, L)
                pl.BlockSpec(memory_space=pltpu.MemorySpace.SMEM),   # b (L,)
            ],
            out_specs=[
                pl.BlockSpec((D, block_b), lambda i: (0, i)),        # x_out tile
                pl.BlockSpec((1, block_b), lambda i: (0, i)),        # log-det row
            ],
            scratch_shapes=[pltpu.VMEM((L, block_b), jnp.float32)],
        ),
        compiler_params=pltpu.CompilerParams(
            dimension_semantics=("parallel",)),
    )(xT, W, U_hat.T, C, b)

    x_out = xoT.T[:Bsz, :]
    log_det = ldT[0, :Bsz].reshape(Bsz, 1)
    return x_out, log_det


def flow_reference(x, W, U, B):
    """Pure-JAX reference mirroring the PyTorch module exactly."""
    Bsz = x.shape[0]
    log_det = jnp.zeros((Bsz, 1), jnp.float32)
    for l in range(W.shape[0]):
        u = U[l:l + 1, :]
        w = W[l:l + 1, :]
        b = B[l]
        inner = jnp.sum(w * u)
        m_inner = jax.nn.softplus(inner) - 1.0
        u_hat = u + (m_inner - inner) * w / jnp.sum(w * w)
        act = jnp.sum(w * x, axis=1, keepdims=True) + b
        t = jnp.tanh(act)
        x = x + u_hat * t
        psi = (1.0 - t * t) * w
        log_det = log_det + jnp.log(
            jnp.abs(1.0 + jnp.sum(u_hat * psi, axis=1, keepdims=True)))
    return x, log_det


if __name__ == "__main__":
    # Small shapes consistent with the module: x is (B, D); chain length L.
    Bsz, D, L = 8, 32, 4

    key = jax.random.PRNGKey(0)
    kx, ku, kw, kb = jax.random.split(key, 4)
    x = jax.random.normal(kx, (Bsz, D), dtype=jnp.float32)
    # Deterministic "torch.randn"-style parameter init for each of the L PlanarFlows.
    U = jax.random.normal(ku, (L, D), dtype=jnp.float32)   # stacked u params (1,D) each
    W = jax.random.normal(kw, (L, D), dtype=jnp.float32)   # stacked w params (1,D) each
    B = jax.random.normal(kb, (L,), dtype=jnp.float32)     # stacked b params (1,) each

    x_out, log_det = flow_forward(x, W, U, B)
    jax.block_until_ready((x_out, log_det))

    x_ref_v, ld_ref_v = flow_reference(x, W, U, B)
    assert jnp.allclose(x_out, x_ref_v, atol=1e-4, rtol=1e-4), \
        float(jnp.max(jnp.abs(x_out - x_ref_v)))
    assert jnp.allclose(log_det, ld_ref_v, atol=1e-4, rtol=1e-4), \
        float(jnp.max(jnp.abs(log_det - ld_ref_v)))

    print("KERNEL_OK")
</pallas_src>

<mosaic_0001>
module attributes {stable_mosaic.version = 11 : i64} {
  func.func @planar_flow_kernel(%arg0: i32, %arg1: memref<32x128xf32, #tpu.memory_space<vmem>>, %arg2: memref<4x32xf32, #tpu.memory_space<vmem>>, %arg3: memref<32x4xf32, #tpu.memory_space<vmem>>, %arg4: memref<4x4xf32, #tpu.memory_space<smem>>, %arg5: memref<4xf32, #tpu.memory_space<smem>>, %arg6: memref<32x128xf32, #tpu.memory_space<vmem>>, %arg7: memref<1x128xf32, #tpu.memory_space<vmem>>, %arg8: memref<4x128xf32, #tpu.memory_space<vmem>>) attributes {dimension_semantics = [#tpu.dimension_semantics<parallel>], iteration_bounds = array<i64: 1>, scalar_prefetch = 0 : i64, scratch_operands = 1 : i64, tpu.core_type = #tpu.core_type<tc>, window_params = [{transform_indices = @transform_0, window_bounds = array<i64: 32, 128>}, {pipeline_mode = #tpu.pipeline_mode<synchronous>, transform_indices = @transform_1, window_bounds = array<i64: 4, 32>}, {pipeline_mode = #tpu.pipeline_mode<synchronous>, transform_indices = @transform_2, window_bounds = array<i64: 32, 4>}, {transform_indices = @transform_3, window_bounds = array<i64: 4, 4>}, {transform_indices = @transform_4, window_bounds = array<i64: 4>}, {transform_indices = @transform_5, window_bounds = array<i64: 32, 128>}, {transform_indices = @transform_6, window_bounds = array<i64: 1, 128>}]} {
    %c0 = arith.constant 0 : index
    %c0_0 = arith.constant 0 : index
    %0 = vector.load %arg2[%c0, %c0_0] : memref<4x32xf32, #tpu.memory_space<vmem>>, vector<4x32xf32>
    %c0_1 = arith.constant 0 : index
    %c0_2 = arith.constant 0 : index
    %1 = vector.load %arg1[%c0_1, %c0_2] : memref<32x128xf32, #tpu.memory_space<vmem>>, vector<32x128xf32>
    %cst = arith.constant dense<0.000000e+00> : vector<4x128xf32>
    %2 = tpu.matmul %0, %1, %cst {dimension_numbers = #tpu.dot_dimension_numbers<[1], [0], [0], [1], [0, 0, 1, 1], [], []>, precision = #tpu.contract_precision<fp32>} : vector<4x32xf32>, vector<32x128xf32>, vector<4x128xf32> -> vector<4x128xf32>
    %cst_3 = arith.constant 0.000000e+00 : f32
    %3 = vector.broadcast %cst_3 : f32 to vector<1x128xf32>
    %4 = vector.extract_strided_slice %2 {offsets = [0, 0], sizes = [1, 128], strides = [1, 1]} : vector<4x128xf32> to vector<1x128xf32>
    %c0_4 = arith.constant 0 : index
    %5 = memref.load %arg5[%c0_4] : memref<4xf32, #tpu.memory_space<smem>>
    %6 = vector.broadcast %5 : f32 to vector<1x128xf32>
    %7 = arith.addf %4, %6 : vector<1x128xf32>
    %8 = math.tanh %7 : vector<1x128xf32>
    %c0_5 = arith.constant 0 : index
    %c0_6 = arith.constant 0 : index
    %9 = vector.load %arg8[%c0_5, %c0_6] : memref<4x128xf32, #tpu.memory_space<vmem>>, vector<1x128xf32>
    tpu.vector_store %arg8[%c0_5, %c0_6], %8 {strides = array<i32>} : memref<4x128xf32, #tpu.memory_space<vmem>>, vector<1x128xf32>,
    %c0_7 = arith.constant 0 : index
    %c0_8 = arith.constant 0 : index
    %10 = memref.load %arg4[%c0_7, %c0_8] : memref<4x4xf32, #tpu.memory_space<smem>>
    %11 = arith.mulf %8, %8 : vector<1x128xf32>
    %cst_9 = arith.constant 1.000000e+00 : f32
    %12 = vector.broadcast %cst_9 : f32 to vector<1x128xf32>
    %13 = arith.subf %12, %11 : vector<1x128xf32>
    %14 = vector.broadcast %10 : f32 to vector<1x128xf32>
    %15 = arith.mulf %13, %14 : vector<1x128xf32>
    %cst_10 = arith.constant 1.000000e+00 : f32
    %16 = vector.broadcast %cst_10 : f32 to vector<1x128xf32>
    %17 = arith.addf %16, %15 : vector<1x128xf32>
    %18 = math.absf %17 : vector<1x128xf32>
    %19 = math.log %18 : vector<1x128xf32>
    %20 = arith.addf %3, %19 : vector<1x128xf32>
    %21 = vector.extract_strided_slice %2 {offsets = [1, 0], sizes = [1, 128], strides = [1, 1]} : vector<4x128xf32> to vector<1x128xf32>
    %c1 = arith.constant 1 : index
    %22 = memref.load %arg5[%c1] : memref<4xf32, #tpu.memory_space<smem>>
    %23 = vector.broadcast %22 : f32 to vector<1x128xf32>
    %24 = arith.addf %21, %23 : vector<1x128xf32>
    %c1_11 = arith.constant 1 : index
    %c0_12 = arith.constant 0 : index
    %25 = memref.load %arg4[%c1_11, %c0_12] : memref<4x4xf32, #tpu.memory_space<smem>>
    %c0_13 = arith.constant 0 : index
    %c0_14 = arith.constant 0 : index
    %26 = vector.load %arg8[%c0_13, %c0_14] : memref<4x128xf32, #tpu.memory_space<vmem>>, vector<1x128xf32>
    %27 = vector.broadcast %25 : f32 to vector<1x128xf32>
    %28 = arith.mulf %27, %26 : vector<1x128xf32>
    %29 = arith.addf %24, %28 : vector<1x128xf32>
    %30 = math.tanh %29 : vector<1x128xf32>
    %c1_15 = arith.constant 1 : index
    %c0_16 = arith.constant 0 : index
    %31 = vector.load %arg8[%c1_15, %c0_16] : memref<4x128xf32, #tpu.memory_space<vmem>>, vector<1x128xf32>
    tpu.vector_store %arg8[%c1_15, %c0_16], %30 {strides = array<i32>} : memref<4x128xf32, #tpu.memory_space<vmem>>, vector<1x128xf32>,
    %c1_17 = arith.constant 1 : index
    %c1_18 = arith.constant 1 : index
    %32 = memref.load %arg4[%c1_17, %c1_18] : memref<4x4xf32, #tpu.memory_space<smem>>
    %33 = arith.mulf %30, %30 : vector<1x128xf32>
    %cst_19 = arith.constant 1.000000e+00 : f32
    %34 = vector.broadcast %cst_19 : f32 to vector<1x128xf32>
    %35 = arith.subf %34, %33 : vector<1x128xf32>
    %36 = vector.broadcast %32 : f32 to vector<1x128xf32>
    %37 = arith.mulf %35, %36 : vector<1x128xf32>
    %cst_20 = arith.constant 1.000000e+00 : f32
    %38 = vector.broadcast %cst_20 : f32 to vector<1x128xf32>
    %39 = arith.addf %38, %37 : vector<1x128xf32>
    %40 = math.absf %39 : vector<1x128xf32>
    %41 = math.log %40 : vector<1x128xf32>
    %42 = arith.addf %20, %41 : vector<1x128xf32>
    %43 = vector.extract_strided_slice %2 {offsets = [2, 0], sizes = [1, 128], strides = [1, 1]} : vector<4x128xf32> to vector<1x128xf32>
    %c2 = arith.constant 2 : index
    %44 = memref.load %arg5[%c2] : memref<4xf32, #tpu.memory_space<smem>>
    %45 = vector.broadcast %44 : f32 to vector<1x128xf32>
    %46 = arith.addf %43, %45 : vector<1x128xf32>
    %c2_21 = arith.constant 2 : index
    %c0_22 = arith.constant 0 : index
    %47 = memref.load %arg4[%c2_21, %c0_22] : memref<4x4xf32, #tpu.memory_space<smem>>
    %c0_23 = arith.constant 0 : index
    %c0_24 = arith.constant 0 : index
    %48 = vector.load %arg8[%c0_23, %c0_24] : memref<4x128xf32, #tpu.memory_space<vmem>>, vector<1x128xf32>
    %49 = vector.broadcast %47 : f32 to vector<1x128xf32>
    %50 = arith.mulf %49, %48 : vector<1x128xf32>
    %51 = arith.addf %46, %50 : vector<1x128xf32>
    %c2_25 = arith.constant 2 : index
    %c1_26 = arith.constant 1 : index
    %52 = memref.load %arg4[%c2_25, %c1_26] : memref<4x4xf32, #tpu.memory_space<smem>>
    %c1_27 = arith.constant 1 : index
    %c0_28 = arith.constant 0 : index
    %53 = vector.load %arg8[%c1_27, %c0_28] : memref<4x128xf32, #tpu.memory_space<vmem>>, vector<1x128xf32>
    %54 = vector.broadcast %52 : f32 to vector<1x128xf32>
    %55 = arith.mulf %54, %53 : vector<1x128xf32>
    %56 = arith.addf %51, %55 : vector<1x128xf32>
    %57 = math.tanh %56 : vector<1x128xf32>
    %c2_29 = arith.constant 2 : index
    %c0_30 = arith.constant 0 : index
    %58 = vector.load %arg8[%c2_29, %c0_30] : memref<4x128xf32, #tpu.memory_space<vmem>>, vector<1x128xf32>
    tpu.vector_store %arg8[%c2_29, %c0_30], %57 {strides = array<i32>} : memref<4x128xf32, #tpu.memory_space<vmem>>, vector<1x128xf32>,
    %c2_31 = arith.constant 2 : index
    %c2_32 = arith.constant 2 : index
    %59 = memref.load %arg4[%c2_31, %c2_32] : memref<4x4xf32, #tpu.memory_space<smem>>
    %60 = arith.mulf %57, %57 : vector<1x128xf32>
    %cst_33 = arith.constant 1.000000e+00 : f32
    %61 = vector.broadcast %cst_33 : f32 to vector<1x128xf32>
    %62 = arith.subf %61, %60 : vector<1x128xf32>
    %63 = vector.broadcast %59 : f32 to vector<1x128xf32>
    %64 = arith.mulf %62, %63 : vector<1x128xf32>
    %cst_34 = arith.constant 1.000000e+00 : f32
    %65 = vector.broadcast %cst_34 : f32 to vector<1x128xf32>
    %66 = arith.addf %65, %64 : vector<1x128xf32>
    %67 = math.absf %66 : vector<1x128xf32>
    %68 = math.log %67 : vector<1x128xf32>
    %69 = arith.addf %42, %68 : vector<1x128xf32>
    %70 = vector.extract_strided_slice %2 {offsets = [3, 0], sizes = [1, 128], strides = [1, 1]} : vector<4x128xf32> to vector<1x128xf32>
    %c3 = arith.constant 3 : index
    %71 = memref.load %arg5[%c3] : memref<4xf32, #tpu.memory_space<smem>>
    %72 = vector.broadcast %71 : f32 to vector<1x128xf32>
    %73 = arith.addf %70, %72 : vector<1x128xf32>
    %c3_35 = arith.constant 3 : index
    %c0_36 = arith.constant 0 : index
    %74 = memref.load %arg4[%c3_35, %c0_36] : memref<4x4xf32, #tpu.memory_space<smem>>
    %c0_37 = arith.constant 0 : index
    %c0_38 = arith.constant 0 : index
    %75 = vector.load %arg8[%c0_37, %c0_38] : memref<4x128xf32, #tpu.memory_space<vmem>>, vector<1x128xf32>
    %76 = vector.broadcast %74 : f32 to vector<1x128xf32>
    %77 = arith.mulf %76, %75 : vector<1x128xf32>
    %78 = arith.addf %73, %77 : vector<1x128xf32>
    %c3_39 = arith.constant 3 : index
    %c1_40 = arith.constant 1 : index
    %79 = memref.load %arg4[%c3_39, %c1_40] : memref<4x4xf32, #tpu.memory_space<smem>>
    %c1_41 = arith.constant 1 : index
    %c0_42 = arith.constant 0 : index
    %80 = vector.load %arg8[%c1_41, %c0_42] : memref<4x128xf32, #tpu.memory_space<vmem>>, vector<1x128xf32>
    %81 = vector.broadcast %79 : f32 to vector<1x128xf32>
    %82 = arith.mulf %81, %80 : vector<1x128xf32>
    %83 = arith.addf %78, %82 : vector<1x128xf32>
    %c3_43 = arith.constant 3 : index
    %c2_44 = arith.constant 2 : index
    %84 = memref.load %arg4[%c3_43, %c2_44] : memref<4x4xf32, #tpu.memory_space<smem>>
    %c2_45 = arith.constant 2 : index
    %c0_46 = arith.constant 0 : index
    %85 = vector.load %arg8[%c2_45, %c0_46] : memref<4x128xf32, #tpu.memory_space<vmem>>, vector<1x128xf32>
    %86 = vector.broadcast %84 : f32 to vector<1x128xf32>
    %87 = arith.mulf %86, %85 : vector<1x128xf32>
    %88 = arith.addf %83, %87 : vector<1x128xf32>
    %89 = math.tanh %88 : vector<1x128xf32>
    %c3_47 = arith.constant 3 : index
    %c0_48 = arith.constant 0 : index
    %90 = vector.load %arg8[%c3_47, %c0_48] : memref<4x128xf32, #tpu.memory_space<vmem>>, vector<1x128xf32>
    tpu.vector_store %arg8[%c3_47, %c0_48], %89 {strides = array<i32>} : memref<4x128xf32, #tpu.memory_space<vmem>>, vector<1x128xf32>,
    %c3_49 = arith.constant 3 : index
    %c3_50 = arith.constant 3 : index
    %91 = memref.load %arg4[%c3_49, %c3_50] : memref<4x4xf32, #tpu.memory_space<smem>>
    %92 = arith.mulf %89, %89 : vector<1x128xf32>
    %cst_51 = arith.constant 1.000000e+00 : f32
    %93 = vector.broadcast %cst_51 : f32 to vector<1x128xf32>
    %94 = arith.subf %93, %92 : vector<1x128xf32>
    %95 = vector.broadcast %91 : f32 to vector<1x128xf32>
    %96 = arith.mulf %94, %95 : vector<1x128xf32>
    %cst_52 = arith.constant 1.000000e+00 : f32
    %97 = vector.broadcast %cst_52 : f32 to vector<1x128xf32>
    %98 = arith.addf %97, %96 : vector<1x128xf32>
    %99 = math.absf %98 : vector<1x128xf32>
    %100 = math.log %99 : vector<1x128xf32>
    %101 = arith.addf %69, %100 : vector<1x128xf32>
    %c0_53 = arith.constant 0 : index
    %c0_54 = arith.constant 0 : index
    %102 = vector.load %arg1[%c0_53, %c0_54] : memref<32x128xf32, #tpu.memory_space<vmem>>, vector<32x128xf32>
    %c0_55 = arith.constant 0 : index
    %c0_56 = arith.constant 0 : index
    %103 = vector.load %arg3[%c0_55, %c0_56] : memref<32x4xf32, #tpu.memory_space<vmem>>, vector<32x4xf32>
    %c0_57 = arith.constant 0 : index
    %c0_58 = arith.constant 0 : index
    %104 = vector.load %arg8[%c0_57, %c0_58] : memref<4x128xf32, #tpu.memory_space<vmem>>, vector<4x128xf32>
    %cst_59 = arith.constant dense<0.000000e+00> : vector<32x128xf32>
    %105 = tpu.matmul %103, %104, %cst_59 {dimension_numbers = #tpu.dot_dimension_numbers<[1], [0], [0], [1], [0, 0, 1, 1], [], []>, precision = #tpu.contract_precision<fp32>} : vector<32x4xf32>, vector<4x128xf32>, vector<32x128xf32> -> vector<32x128xf32>
    %106 = arith.addf %102, %105 : vector<32x128xf32>
    %c0_60 = arith.constant 0 : index
    %c0_61 = arith.constant 0 : index
    %107 = vector.load %arg6[%c0_60, %c0_61] : memref<32x128xf32, #tpu.memory_space<vmem>>, vector<32x128xf32>
    tpu.vector_store %arg6[%c0_60, %c0_61], %106 {strides = array<i32>} : memref<32x128xf32, #tpu.memory_space<vmem>>, vector<32x128xf32>,
    %c0_62 = arith.constant 0 : index
    %c0_63 = arith.constant 0 : index
    %108 = vector.load %arg7[%c0_62, %c0_63] : memref<1x128xf32, #tpu.memory_space<vmem>>, vector<1x128xf32>
    tpu.vector_store %arg7[%c0_62, %c0_63], %101 {strides = array<i32>} : memref<1x128xf32, #tpu.memory_space<vmem>>, vector<1x128xf32>,
    return
  }
  func.func @transform_0(%arg0: i32) -> (i32, i32) {
    %c0_i32 = arith.constant 0 : i32
    %c0_i32_0 = arith.constant 0 : i32
    return %c0_i32, %arg0 : i32, i32
  }
  func.func @transform_1(%arg0: i32) -> (i32, i32) {
    %c0_i32 = arith.constant 0 : i32
    %c0_i32_0 = arith.constant 0 : i32
    %c0_i32_1 = arith.constant 0 : i32
    return %c0_i32, %c0_i32_0 : i32, i32
  }
  func.func @transform_2(%arg0: i32) -> (i32, i32) {
    %c0_i32 = arith.constant 0 : i32
    %c0_i32_0 = arith.constant 0 : i32
    %c0_i32_1 = arith.constant 0 : i32
    return %c0_i32, %c0_i32_0 : i32, i32
  }
  func.func @transform_3(%arg0: i32) -> (i32, i32) {
    %c0_i32 = arith.constant 0 : i32
    %c0_i32_0 = arith.constant 0 : i32
    %c0_i32_1 = arith.constant 0 : i32
    return %c0_i32, %c0_i32_0 : i32, i32
  }
  func.func @transform_4(%arg0: i32) -> i32 {
    %c0_i32 = arith.constant 0 : i32
    %c0_i32_0 = arith.constant 0 : i32
    return %c0_i32 : i32
  }
  func.func @transform_5(%arg0: i32) -> (i32, i32) {
    %c0_i32 = arith.constant 0 : i32
    %c0_i32_0 = arith.constant 0 : i32
    return %c0_i32, %arg0 : i32, i32
  }
  func.func @transform_6(%arg0: i32) -> (i32, i32) {
    %c0_i32 = arith.constant 0 : i32
    %c0_i32_0 = arith.constant 0 : i32
    return %c0_i32, %arg0 : i32, i32
  }
}

</mosaic_0001>

<bundles_post_ra>
// kernel: tpu_custom_call.1
= control target key start
LH: loop header
LB: loop body
LE: loop exit
PB: predicated region body
PF: predicated region fallthrough
CT: control target
= control target key end

     0   :  { %12 = vsyncpa [#allocation5], 0  ;;  %s1843_s0 = inlined_call_operand.vmem [shape: f32[32,128], index: 0, kind: input, shape index: {}]   ;;  %s1844_s1 = inlined_call_operand.vmem [shape: f32[4,32], index: 1, kind: input, shape index: {}]   ;;  %s1845_s2 = inlined_call_operand.vmem [shape: f32[32,4], index: 2, kind: input, shape index: {}]   ;;  %s1846_s3 = inlined_call_operand.vmem [shape: f32[4,4], index: 3, kind: input, shape index: {}]   ;;  %s1847_s4 = inlined_call_operand.vmem [shape: f32[4], index: 4, kind: input, shape index: {}]   ;;  %s1848_s5 = inlined_call_operand.hbm [shape: f32[32,128], index: 5, kind: output, shape index: {0}]   ;;  %s1849_s6 = inlined_call_operand.hbm [shape: f32[1,128], index: 6, kind: output, shape index: {1}]  }
   0x1   :  { %13 = vsyncpa [#allocation7], 0 }
   0x2   :  { %14 = vsyncpa [#allocation4], 0 }
   0x3   :  { %15 = vsyncpa [#allocation10], 0  ;;  %s28_s23 = sshll.u32 %s1846_s3, 4  ;;  %s38_s26 = sshll.u32 %s1847_s4, 4  ;;  %s29_s23 = int_to_ptr.vmem [resolvable:$true] %s28_s23  ;;  %s39_s26 = int_to_ptr.vmem [resolvable:$true] %s38_s26 }
   0x4   :  { %s1579_s27 = scalar_lea.vmem %s29_s23, 64  ;;  %p1584_p1 = scmp.lt.s32.totalorder %s29_s23, %s29_s23 }
   0x5   :  { %p1580_p0 = scmp.ne.s32.totalorder %s29_s23, %s1579_s27  ;;  %p1585_p2 = scmp.lt.s32.totalorder %s1579_s27, %s1579_s27 }
   0x7   :  { %p1586_p3 = por %p1585_p2, %p1584_p1 }
   0x9   :  { %p1587_p4 = pnand %p1586_p3, %p1580_p0 }
   0xb   :  { %1590 = shalt.err (!%p1587_p4)
}
   0xc   :  { %s1655_s28 = smov [#allocation3]   ;;  %s1591_s29 = scalar_lea.vmem %s39_s26, 16 }
   0xd   :  { %31 = dma.vmem_to_smem %s29_s23, 64, %s1655_s28, [#allocation5]  }
   0xe   :  { %p1592_p5 = scmp.ne.s32.totalorder %s39_s26, %s1591_s29  ;;  %p1596_p6 = scmp.lt.s32.totalorder %s39_s26, %s39_s26 }
   0xf   :  { %p1597_p7 = scmp.lt.s32.totalorder %s1591_s29, %s1591_s29 }
  0x11   :  { %p1598_p8 = por %p1597_p7, %p1596_p6 }
  0x13   :  { %p1599_p9 = pnand %p1598_p8, %p1592_p5 }
  0x15   :  { %1602 = shalt.err (!%p1599_p9)
}
  0x16   :  { %s1656_s3 = smov [#allocation6]  }
  0x17   :  { %41 = dma.vmem_to_smem %s39_s26, 16, %s1656_s3, [#allocation7]  }
  0x18   :  { %1647 = dma.done.wait [#allocation5], 64  }
  0x19   :  { %1648 = vsyncadd [#allocation5], 4294967232 }
  0x1a   :  { %1649 = dma.done.wait [#allocation7], 16  }
  0x1b   :  { %1650 = vsyncadd [#allocation7], 4294967280 }
  0x1c   :  { %48 = sfence }
  0x1d   :  { %v1708_v0 = vld [vmem:[%s1843_s0] sm:$0xff]  ;;  %v1713_v1 = vld [vmem:[%s1843_s0 + $0x8] sm:$0xff]  ;;  %v1718_v2 = vld [vmem:[%s1843_s0 + $0x10] sm:$0xff]  ;;  %v1657_v3 = vmov 0.0|0.0   ;;  %vm1658_vm0 = vmmov 0   ;;  %v1659_v8 = vmov 0.0  }
  0x1e   :  { %1488 = vmatprep.subr.bf16.mxu0 %v1657_v3  ;;  %v59_v4 = vand.u32 4294901760, %v1708_v0  ;;  %v62_v5 = vand.u32 4294901760, %v1713_v1  ;;  %v1726_v6 = vld [vmem:[%s1843_s0 + $0x18] sm:$0xff]  ;;  %v65_v7 = vand.u32 4294901760, %v1718_v2  ;;  %1382 = vmatprep.mubr.msk.f32.mxu0 %vm1658_vm0, %v1659_v8  ;;  %v49_v9 = vld [vmem:[%s1844_s1] sm:$0xf] }
  0x1f   :  { %v68_v10 = vand.u32 4294901760, %v1726_v6  ;;  %vm54_vm1 = vcmask 261120   ;;  %v664_v41 = vld [vmem:[%s1845_s2] sm:$0xff]  ;;  %vm669_vm2 = vcmask 31744   ;;  %s543_s15 = sld [smem:[#allocation6]]  ;;  %s1302_s17 = sld [smem:[#allocation6 + $0x1]] }
  0x20   :  { %v1489_v11 = vpack.c.bf16 %v62_v5, %v59_v4  ;;  %v139_v12 = vsub.f32 %v1708_v0, %v59_v4  ;;  %v146_v13 = vsub.f32 %v1713_v1, %v62_v5  ;;  %v153_v14 = vsub.f32 %v1718_v2, %v65_v7  ;;  %s1303_s16 = sld [smem:[#allocation3 + $0x80]]  ;;  %s1304_s20 = sld [smem:[#allocation3 + $0x81]] }
  0x21   :  { %v1492_v15 = vpack.c.bf16 %v68_v10, %v65_v7  ;;  %v160_v16 = vsub.f32 %v1726_v6, %v68_v10  ;;  %v56_v17 = vsel %vm54_vm1, %v49_v9, 0  ;;  %v671_v42 = vsel %vm669_vm2, %v664_v41, 0  ;;  %s548_s18 = sld [smem:[#allocation3]]  ;;  %s1305_s21 = sld [smem:[#allocation6 + $0x2]] }
  0x22   :  { %1490 = vmatpush3.bf16.msra.mxu0 %v1489_v11  ;;  %v127_v18 = vand.u32 4294901760, %v56_v17  ;;  %v140_v19 = vand.u32 4294901760, %v139_v12  ;;  %v147_v20 = vand.u32 4294901760, %v146_v13  ;;  %v154_v21 = vand.u32 4294901760, %v153_v14  ;;  %s1306_s19 = sld [smem:[#allocation3 + $0x100]]  ;;  %s1307_s22 = sld [smem:[#allocation3 + $0x101]] }
  0x23   :  { %1491 = vmatprep.subr.bf16.mxu0 %v1657_v3  ;;  %v161_v22 = vand.u32 4294901760, %v160_v16  ;;  %v1501_v37 = vpack.c.bf16 %v146_v13, %v139_v12  ;;  %v1504_v38 = vpack.c.bf16 %v160_v16, %v153_v14  ;;  %v1764_v43 = vand.u32 4294901760, %v671_v42  ;;  %s1310_s23 = sld [smem:[#allocation3 + $0x180]]  ;;  %s1311_s24 = sld [smem:[#allocation3 + $0x181]] }
  0x24   :  { %v128_v23 = vsub.f32 %v56_v17, %v127_v18  ;;  %v141_v24 = vsub.f32 %v139_v12, %v140_v19  ;;  %v148_v25 = vsub.f32 %v146_v13, %v147_v20  ;;  %v155_v26 = vsub.f32 %v153_v14, %v154_v21  ;;  %s1308_s25 = sld [smem:[#allocation3 + $0x102]]  ;;  %s1309_s26 = sld [smem:[#allocation6 + $0x3]] }
  0x25   :  { %v162_v27 = vsub.f32 %v160_v16, %v161_v22  ;;  %v1513_v39 = vpack.c.bf16 %v147_v20, %v140_v19  ;;  %v1516_v40 = vpack.c.bf16 %v161_v22, %v154_v21  ;;  %v1767_v44 = vsub.f32 %v671_v42, %v1764_v43  ;;  %s1312_s27 = sld [smem:[#allocation3 + $0x182]]  ;;  %s1313_s8 = sld [smem:[#allocation3 + $0x183]] }
  0x26   :  { %1493 = vmatpush3.bf16.msra.mxu0 %v1492_v15  ;;  %v129_v28 = vand.u32 4294901760, %v128_v23  ;;  %v142_v29 = vand.u32 4294901760, %v141_v24  ;;  %v149_v30 = vand.u32 4294901760, %v148_v25  ;;  %v156_v33 = vand.u32 4294901760, %v155_v26 }
  0x27   :  { %1494 = vmatprep.subr.bf16.mxu0 %v1657_v3  ;;  %v163_v34 = vand.u32 4294901760, %v162_v27  ;;  %v754_v45 = vand.u32 4294901760, %v1767_v44  ;;  %v544_v48 = vstv %s543_s15  ;;  %v563_v53 = vstv %s1303_s16 }
  0x28   :  { %v130_v31 = vsub.f32 %v128_v23, %v129_v28  ;;  %v1495_v32 = vpack.c.bf16 %v149_v30, %v142_v29  ;;  %v559_v54 = vstv %s1302_s17  ;;  %v551_v62 = vstv %s548_s18 }
  0x29   :  { %v1498_v36 = vpack.c.bf16 %v163_v34, %v156_v33  ;;  %v755_v46 = vsub.f32 %v1767_v44, %v754_v45  ;;  %v589_v5 = vstv %s1306_s19  ;;  %v574_v9 = vstv %s1304_s20 }
  0x2a   :  { %v131_v35 = vand.u32 4294901760, %v130_v31  ;;  %v585_v13 = vstv %s1305_s21  ;;  %v597_v14 = vstv %s1307_s22  ;;  %v623_v29 = vstv %s1310_s23 }
  0x2b   :  { %v756_v47 = vand.u32 4294901760, %v755_v46  ;;  %v631_v34 = vstv %s1311_s24  ;;  %v619_v41 = vstv %s1309_s26  ;;  %vm682_vm3 = vcmask 1043456  }
  0x2c   :  { %1383 = vmatmul.mubr.f32.vlgmr.msra.gmra.mrb[0].mxu0 %v131_v35 }
  0x2d   :  { %1496 = vmatpush3.bf16.msra.mxu0 %v1495_v32  ;;  %1393 = vmatprep.mubr.msk.f32.mxu0 %vm1658_vm0, %v1659_v8 }
  0x2e   :  { %1497 = vmatprep.subr.bf16.mxu0 %v1657_v3  ;;  %1442 = vmatprep.mubr.f32.mxu1 %v756_v47  ;;  %v639_v47 = vstv %s1312_s27 }
  0x31   :  { %1499 = vmatpush3.bf16.msra.mxu0 %v1498_v36 }
  0x32   :  { %1500 = vmatprep.subr.bf16.mxu0 %v1657_v3 }
  0x34   :  { %1394 = vmatmul.mubr.f32.vlgmr.msra.gmra.mrb[0].mxu0 %v127_v18 }
  0x35   :  { %1502 = vmatpush3.bf16.msra.mxu0 %v1501_v37  ;;  %1404 = vmatprep.mubr.msk.f32.mxu0 %vm1658_vm0, %v1659_v8 }
  0x36   :  { %1503 = vmatprep.subr.bf16.mxu0 %v1657_v3 }
  0x39   :  { %1505 = vmatpush3.bf16.msra.mxu0 %v1504_v38  ;;  %v608_v38 = vstv %s1308_s25 }
  0x3a   :  { %1506 = vmatprep.subr.bf16.mxu0 %v1657_v3 }
  0x3c   :  { %1405 = vmatmul.mubr.f32.vlgmr.msra.gmra.mrb[0].mxu0 %v128_v23 }
  0x3d   :  { %1508 = vmatpush3.bf16.msra.mxu0 %v1489_v11  ;;  %1415 = vmatprep.mubr.msk.f32.mxu0 %vm1658_vm0, %v1659_v8 }
  0x3e   :  { %1509 = vmatprep.subr.bf16.mxu0 %v1657_v3 }
  0x41   :  { %1511 = vmatpush3.bf16.msra.mxu0 %v1492_v15 }
  0x42   :  { %1512 = vmatprep.subr.bf16.mxu0 %v1657_v3 }
  0x44   :  { %1416 = vmatmul.mubr.f32.vlgmr.msra.gmra.mrb[0].mxu0 %v129_v28 }
  0x45   :  { %1514 = vmatpush3.bf16.msra.mxu0 %v1513_v39  ;;  %1426 = vmatprep.mubr.msk.f32.mxu0 %vm1658_vm0, %v1659_v8 }
  0x46   :  { %1515 = vmatprep.subr.bf16.mxu0 %v1657_v3 }
  0x49   :  { %1517 = vmatpush3.bf16.msra.mxu0 %v1516_v40 }
  0x4a   :  { %1518 = vmatprep.subr.bf16.mxu0 %v1657_v3 }
  0x4c   :  { %1427 = vmatmul.mubr.f32.vlgmr.msra.gmra.mrb[0].mxu0 %v127_v18 }
  0x4d   :  { %1520 = vmatpush3.bf16.msra.mxu0 %v1489_v11  ;;  %1437 = vmatprep.mubr.msk.f32.mxu0 %vm1658_vm0, %v1659_v8 }
  0x4e   :  { %1521 = vmatprep.subr.bf16.mxu0 %v1657_v3 }
  0x51   :  { %1523 = vmatpush3.bf16.msra.mxu0 %v1492_v15 }
  0x54   :  { %1438 = vmatmul.mubr.f32.vlgmr.msra.gmra.mrb[0].mxu0 %v127_v18 }
 0x127   :  { %v1773_v49 = vpop.f32.mrb[0].mxu0 }
 0x128   :  { %v545_v50 = vadd.f32 %v544_v48, %v1773_v49  ;;  %v1439_v51 = vpop.f32.mrb[1].mxu0  ;;  %v560_v57 = vadd.f32 %v559_v54, %v1773_v49  ;;  %v586_v19 = vadd.f32 %v585_v13, %v1773_v49  ;;  %v620_v48 = vadd.f32 %v619_v41, %v1773_v49 }
 0x12a   :  { %1563 = vtanh.f32 %v545_v50 }
 0x134   :  { %v1564_v52 = vpop.eup %1563 }
 0x135   :  { %547 = vst [vmem:[#allocation2] sm:$0x1] %v1564_v52  ;;  %v549_v60 = vmul.f32 %v1564_v52, %v1564_v52 }
 0x137   :  { %v550_v61 = vsub.f32 1.0, %v549_v60  ;;  %v666_v60 = vld [vmem:[%s1845_s2 + $0x10] sm:$0xff] }
 0x139   :  { %v552_v63 = vmul.f32 %v551_v62, %v550_v61  ;;  %v677_v61 = vsel %vm669_vm2, %v666_v60, 0  ;;  %v667_v62 = vld [vmem:[%s1845_s2 + $0x18] sm:$0xff] }
 0x13b   :  { %v553_v8 = vadd.f32 1.0, %v552_v63 }
 0x13c   :  { %v562_v55 = vld [vmem:[#allocation2] sm:$0x1] }
 0x13d   :  { %v564_v56 = vmul.f32 %v563_v53, %v562_v55  ;;  %v588_v4 = vld [vmem:[#allocation2] sm:$0x1]  ;;  %v554_v15 = vand.u32 2147483647, %v553_v8 }
 0x13e   :  { %v590_v10 = vmul.f32 %v589_v5, %v588_v4  ;;  %v622_v28 = vld [vmem:[#allocation2] sm:$0x1]  ;;  %v680_v4 = vsel %vm669_vm2, %v667_v62, 0 }
 0x13f   :  { %v566_v58 = vrot.slane %v564_v56, 7  ;;  %v624_v35 = vmul.f32 %v623_v29, %v622_v28 }
 0x140   :  { %v592_v16 = vrot.slane %v590_v10, 6 }
 0x141   :  { %v568_v59 = vadd.f32 %v566_v58, %v560_v57  ;;  %v626_v42 = vrot.slane %v624_v35, 5 }
 0x142   :  { %v594_v22 = vadd.f32 %v592_v16, %v586_v19 }
 0x143   :  { %1565 = vtanh.f32 %v568_v59  ;;  %v628_v53 = vadd.f32 %v626_v42, %v620_v48  ;;  %v665_v59 = vld [vmem:[%s1845_s2 + $0x8] sm:$0xff]  ;;  %s1660_s2 = smov [#allocation9]  }
 0x144   :  { %1567 = vlog2.f32 %v554_v15  ;;  %v674_v49 = vsel %vm669_vm2, %v665_v59, 0  ;;  %s1288_s9 = sshll.u32 %s1660_s2, 4  ;;  %s1289_s9 = int_to_ptr.vmem [resolvable:$true] %s1288_s9 }
 0x145   :  { %v1790_v63 = vand.u32 4294901760, %v674_v49  ;;  %s1603_s10 = scalar_lea.vmem %s1289_s9, 16  ;;  %s1607_s11 = scalar_lea.vmem %s1289_s9, 32 }
 0x146   :  { %p1604_p10 = scmp.ne.s32.totalorder %s1289_s9, %s1603_s10  ;;  %p1608_p11 = scmp.lt.s32.totalorder %s1289_s9, %s1289_s9 }
 0x147   :  { %v763_v8 = vsub.f32 %v674_v49, %v1790_v63  ;;  %p1609_p12 = scmp.lt.s32.totalorder %s1607_s11, %s1603_s10 }
 0x149   :  { %v764_v15 = vand.u32 4294901760, %v763_v8  ;;  %p1610_p13 = por %p1609_p12, %p1608_p11 }
 0x14b   :  { %p1611_p0 = pnand %p1610_p13, %p1604_p10 }
 0x14d   :  { %v1566_v3 = vpop.eup %1565 }
 0x14e   :  { %570 = vst [vmem:[#allocation2] sm:$0x2] %v1566_v3  ;;  %v572_v7 = vmul.f32 %v1566_v3, %v1566_v3  ;;  %v1568_v25 = vpop.eup %1567  ;;  %v1792_v3 = vand.u32 4294901760, %v677_v61 }
 0x14f   :  { %v556_v30 = vmul.f32 0.6931472, %v1568_v25 }
 0x150   :  { %v573_v11 = vsub.f32 1.0, %v572_v7  ;;  %v773_v10 = vsub.f32 %v677_v61, %v1792_v3 }
 0x152   :  { %v575_v12 = vmul.f32 %v574_v9, %v573_v11  ;;  %v1796_v9 = vand.u32 4294901760, %v680_v4 }
 0x154   :  { %v576_v17 = vadd.f32 1.0, %v575_v12  ;;  %v783_v16 = vsub.f32 %v680_v4, %v1796_v9 }
 0x155   :  { %v596_v18 = vld [vmem:[#allocation2 + $0x1] sm:$0x1] }
 0x156   :  { %v598_v20 = vmul.f32 %v597_v14, %v596_v18  ;;  %v577_v21 = vand.u32 2147483647, %v576_v17  ;;  %v630_v33 = vld [vmem:[#allocation2 + $0x1] sm:$0x1]  ;;  %v650_v17 = vstv %s1313_s8  ;;  %v774_v18 = vand.u32 4294901760, %v773_v10 }
 0x157   :  { %v632_v39 = vmul.f32 %v631_v34, %v630_v33 }
 0x158   :  { %v600_v23 = vrot.slane %v598_v20, 6  ;;  %1569 = vlog2.f32 %v577_v21  ;;  %v765_v21 = vsub.f32 %v763_v8, %v764_v15 }
 0x159   :  { %v634_v50 = vrot.slane %v632_v39, 5 }
 0x15a   :  { %v602_v24 = vadd.f32 %v600_v23, %v594_v22  ;;  %v784_v22 = vand.u32 4294901760, %v783_v16  ;;  %v775_v23 = vsub.f32 %v773_v10, %v774_v18  ;;  %v766_v29 = vand.u32 4294901760, %v765_v21 }
 0x15b   :  { %v636_v56 = vadd.f32 %v634_v50, %v628_v53 }
 0x15c   :  { %1571 = vtanh.f32 %v602_v24 }
 0x162   :  { %v1570_v26 = vpop.eup %1569 }
 0x163   :  { %v579_v27 = vmul.f32 0.6931472, %v1570_v26 }
 0x165   :  { %v581_v31 = vrot.slane %v579_v27, 1 }
 0x166   :  { %v1572_v32 = vpop.eup %1571 }
 0x167   :  { %604 = vst [vmem:[#allocation2] sm:$0x4] %v1572_v32  ;;  %v583_v36 = vadd.f32 %v581_v31, %v556_v30  ;;  %v606_v37 = vmul.f32 %v1572_v32, %v1572_v32  ;;  %v785_v30 = vsub.f32 %v783_v16, %v784_v22  ;;  %v776_v31 = vand.u32 4294901760, %v775_v23 }
 0x169   :  { %v607_v40 = vsub.f32 1.0, %v606_v37  ;;  %v786_v33 = vand.u32 4294901760, %v785_v30 }
 0x16b   :  { %v609_v46 = vmul.f32 %v608_v38, %v607_v40 }
 0x16d   :  { %v610_v51 = vadd.f32 1.0, %v609_v46 }
 0x16e   :  { %v638_v52 = vld [vmem:[#allocation2 + $0x2] sm:$0x1] }
 0x16f   :  { %v640_v54 = vmul.f32 %v639_v47, %v638_v52  ;;  %v611_v55 = vand.u32 2147483647, %v610_v51 }
 0x171   :  { %v642_v57 = vrot.slane %v640_v54, 5  ;;  %1573 = vlog2.f32 %v611_v55 }
 0x173   :  { %v644_v58 = vadd.f32 %v642_v57, %v636_v56 }
 0x175   :  { %1575 = vtanh.f32 %v644_v58 }
 0x17b   :  { %v1574_v5 = vpop.eup %1573 }
 0x17c   :  { %v613_v7 = vmul.f32 0.6931472, %v1574_v5 }
 0x17e   :  { %v615_v11 = vrot.slane %v613_v7, 2 }
 0x17f   :  { %v1576_v12 = vpop.eup %1575 }
 0x180   :  { %646 = vst [vmem:[#allocation2] sm:$0x8] %v1576_v12  ;;  %v617_v13 = vadd.f32 %v615_v11, %v583_v36  ;;  %v648_v14 = vmul.f32 %v1576_v12, %v1576_v12 }
 0x182   :  { %v649_v19 = vsub.f32 1.0, %v648_v14 }
 0x184   :  { %v651_v20 = vmul.f32 %v650_v17, %v649_v19 }
 0x186   :  { %v652_v24 = vadd.f32 1.0, %v651_v20 }
 0x187   :  { %v668_v25 = vld [vmem:[#allocation2] sm:$0xf] }
 0x188   :  { %v684_v26 = vsel %vm682_vm3, %v668_v25, 0  ;;  %v653_v27 = vand.u32 2147483647, %v652_v24 }
 0x189   :  { %v687_v28 = vand.u32 4294901760, %v684_v26 }
 0x18a   :  { %1577 = vlog2.f32 %v653_v27 }
 0x18b   :  { %1440 = vmatprep.subr.mxu1 %v687_v28  ;;  %v794_v32 = vsub.f32 %v684_v26, %v687_v28 }
 0x18c   :  { %1441 = vmatpush3.msra.mxu1 %v687_v28 }
 0x18d   :  { %1443 = vmatmul.mubr.f32.vlgmr.msra.gmra.mrb[0].mxu1 %v766_v29  ;;  %v795_v34 = vand.u32 4294901760, %v794_v32 }
 0x18e   :  { %1445 = vmatprep.mubr.f32.mxu1 %v776_v31 }
 0x18f   :  { %v796_v35 = vsub.f32 %v794_v32, %v795_v34 }
 0x191   :  { %1446 = vmatmul.mubr.f32.gmra.mrb[2].mxu1 %v786_v33  ;;  %v797_v36 = vand.u32 4294901760, %v796_v35 }
 0x192   :  { %1450 = vmatprep.mubr.f32.mxu1 %v1764_v43 }
 0x193   :  { %1448 = vmatprep.subr.mxu1 %v797_v36 }
 0x194   :  { %v1578_v37 = vpop.eup %1577  ;;  %1449 = vmatpush3.msra.mxu1 %v797_v36 }
 0x195   :  { %1451 = vmatmul.mubr.f32.vlgmr.msra.gmra.mrb[0].mxu1 %v1790_v63  ;;  %1456 = vmatprep.subr.mxu1 %v794_v32  ;;  %v655_v38 = vmul.f32 0.6931472, %v1578_v37 }
 0x196   :  { %1457 = vmatpush3.msra.mxu1 %v794_v32  ;;  %1453 = vmatprep.mubr.f32.mxu1 %v1792_v3 }
 0x197   :  { %1464 = vmatprep.subr.mxu1 %v687_v28  ;;  %v657_v39 = vrot.slane %v655_v38, 3 }
 0x199   :  { %1454 = vmatmul.mubr.f32.gmra.mrb[2].mxu1 %v1796_v9  ;;  %v659_v40 = vadd.f32 %v657_v39, %v617_v13 }
 0x19a   :  { %1458 = vmatprep.mubr.f32.mxu1 %v1767_v44 }
 0x19b   :  { %1269 = vst [vmem:[#allocation9] sm:$0x1] %v659_v40 }
 0x19d   :  { %1459 = vmatmul.mubr.f32.vlgmr.msra.gmra.mrb[0].mxu1 %v763_v8 }
 0x19e   :  { %1465 = vmatpush3.msra.mxu1 %v687_v28  ;;  %1461 = vmatprep.mubr.f32.mxu1 %v773_v10 }
 0x19f   :  { %1472 = vmatprep.subr.mxu1 %v795_v34 }
 0x1a1   :  { %1462 = vmatmul.mubr.f32.gmra.mrb[2].mxu1 %v783_v16 }
 0x1a2   :  { %1466 = vmatprep.mubr.f32.mxu1 %v754_v45 }
 0x1a5   :  { %1467 = vmatmul.mubr.f32.vlgmr.msra.gmra.mrb[0].mxu1 %v764_v15 }
 0x1a6   :  { %1473 = vmatpush3.msra.mxu1 %v795_v34  ;;  %1469 = vmatprep.mubr.f32.mxu1 %v774_v18 }
 0x1a7   :  { %1480 = vmatprep.subr.mxu1 %v687_v28 }
 0x1a9   :  { %1470 = vmatmul.mubr.f32.gmra.mrb[2].mxu1 %v784_v22 }
 0x1aa   :  { %1474 = vmatprep.mubr.f32.mxu1 %v1764_v43 }
 0x1ad   :  { %1475 = vmatmul.mubr.f32.vlgmr.msra.gmra.mrb[0].mxu1 %v1790_v63 }
 0x1ae   :  { %1481 = vmatpush3.msra.mxu1 %v687_v28  ;;  %1477 = vmatprep.mubr.f32.mxu1 %v1792_v3 }
 0x1b1   :  { %1478 = vmatmul.mubr.f32.gmra.mrb[2].mxu1 %v1796_v9 }
 0x1b2   :  { %1482 = vmatprep.mubr.f32.mxu1 %v1764_v43 }
 0x1b5   :  { %1483 = vmatmul.mubr.f32.vlgmr.msra.gmra.mrb[0].mxu1 %v1790_v63 }
 0x1b6   :  { %1485 = vmatprep.mubr.f32.mxu1 %v1792_v3 }
 0x1b9   :  { %1486 = vmatmul.mubr.f32.gmra.mrb[2].mxu1 %v1796_v9 }
 0x1ba   :  { %1614 = shalt.err (!%p1611_p0)
}
 0x1bb   :  { %s1615_s14 = scalar_lea.hbm %s1849_s6, 16 }
 0x1bc   :  { %p1616_p1 = scmp.ne.s32.totalorder %s1849_s6, %s1615_s14  ;;  %p1619_p2 = scmp.lt.u32.totalorder %s1615_s14, %s1849_s6 }
 0x1be   :  { %p1621_p3 = pnand %p1619_p2, %p1616_p1 }
 0x1c0   :  { %1624 = shalt.err (!%p1621_p3)
}
 0x1c1   :  { %1291 = dma.vmem_to_hbm [thread:$0]  %s1289_s9, 16, %s1849_s6, [#allocation10]  }
 0x1c2   :  { %s1661_s19 = smov [#allocation8]  }
 0x1c3   :  { %s1275_s20 = sshll.u32 %s1661_s19, 4  ;;  %s1276_s20 = int_to_ptr.vmem [resolvable:$true] %s1275_s20 }
 0x1c4   :  { %s1625_s6 = scalar_lea.vmem %s1276_s20, 512  ;;  %p1630_p5 = scmp.lt.s32.totalorder %s1276_s20, %s1276_s20 }
 0x1c5   :  { %p1626_p4 = scmp.ne.s32.totalorder %s1276_s20, %s1625_s6  ;;  %p1631_p6 = scmp.lt.s32.totalorder %s1625_s6, %s1625_s6 }
 0x1c7   :  { %p1632_p7 = por %p1631_p6, %p1630_p5 }
 0x1c9   :  { %p1633_p8 = pnand %p1632_p7, %p1626_p4 }
 0x288   :  { %v1484_v43 = vpop.f32.mrb[0].mxu1 }
 0x289   :  { %v1262_v44 = vadd.f32 %v1484_v43, %v1713_v1  ;;  %v1239_v45 = vpop.f32.mrb[1].mxu1 }
 0x28a   :  { %v1261_v41 = vadd.f32 %v1239_v45, %v1708_v0 }
 0x28b   :  { %1266 = vst [vmem:[#allocation8 + $0x8] sm:$0xff] %v1262_v44 }
 0x28c   :  { %1265 = vst [vmem:[#allocation8] sm:$0xff] %v1261_v41  ;;  %v1487_v42 = vpop.f32.mrb[2].mxu1 }
 0x28d   :  { %v1264_v46 = vadd.f32 %v1487_v42, %v1726_v6  ;;  %v1251_v47 = vpop.f32.mrb[3].mxu1 }
 0x28e   :  { %v1263_v48 = vadd.f32 %v1251_v47, %v1718_v2 }
 0x28f   :  { %1268 = vst [vmem:[#allocation8 + $0x18] sm:$0xff] %v1264_v46 }
 0x290   :  { %1267 = vst [vmem:[#allocation8 + $0x10] sm:$0xff] %v1263_v48 }
 0x291   :  { %1636 = shalt.err (!%p1633_p8)
}
 0x292   :  { %s1637_s23 = scalar_lea.hbm %s1848_s5, 512 }
 0x293   :  { %p1638_p9 = scmp.ne.s32.totalorder %s1848_s5, %s1637_s23  ;;  %p1641_p10 = scmp.lt.u32.totalorder %s1637_s23, %s1848_s5 }
 0x295   :  { %p1643_p11 = pnand %p1641_p10, %p1638_p9 }
 0x297   :  { %1646 = shalt.err (!%p1643_p11)
}
 0x298   :  { %s1662_s28 = smov 128   ;;  %s1663_s29 = smov 8  }
 0x299   :  { %1281 = dma.vmem_to_hbm [thread:$0]  %s1276_s20, 512, %s1848_s5, [#allocation4], %s1662_s28, %s1662_s28, %s1663_s29  }
 0x29a   :  { %1651 = dma.done.wait [#allocation4], 512  }
 0x29b   :  { %1652 = vsyncadd [#allocation4], 4294966784 }
 0x29c   :  { %1653 = dma.done.wait [#allocation10], 16  }
 0x29d   :  { %1654 = vsyncadd [#allocation10], 4294967280 }
 0x29e   :  { %1298 = vsyncpa [#allocation4], 1 }
 0x29f   :  { %1299 = vsyncpa [#allocation10], 1 }
 0x2a0   :  { %1300 = vsyncpa [#allocation5], 1 }
 0x2a1   :  { %1301 = vsyncpa [#allocation7], 1 }

</bundles_post_ra>
